<compile_context>
chip_gen: v7x
topology: tpu7x:2x2x1
jax: 0.10.0
libtpu: 0.0.40
codegen_flags: <defaults>
</compile_context>

<pallas_src>
import math

import jax
import jax.numpy as jnp
from jax.experimental import pallas as pl
from jax.experimental.pallas import tpu as pltpu

CLAMP_LO = 0.0001
CLAMP_HI = 1.0 - 0.0001
_LOG_LO = math.log(CLAMP_LO)   # log(1e-4)
_LOG_HI = math.log(CLAMP_HI)   # log(1 - 1e-4)


def _cdiv(a, b):
    return -(-a // b)


def _round_up(a, b):
    return _cdiv(a, b) * b


def _make_bce_kernel(lanes: int, tile_r: int, steps: int, total_valid: int, ent_loss: bool):
    """Kernel over (tile_r, lanes) blocks; accumulates into a resident (8, lanes) block.

    stats rows: 0: sum(-label_neg*log_neg)  1: sum(-label_pos*log_pos)
                2: sum(label_neg)           3: sum(label_pos)
                4: sum(neg*log_neg + pos*log_pos)  (entropy partial, per lane)
                5..7: unused (padding to an 8-sublane block)
    """

    def kernel(preds_ref, lneg_ref, lpos_ref, stats_ref):
        @pl.when(pl.program_id(1) == 0)
        def _init():
            stats_ref[...] = jnp.zeros_like(stats_ref)

        x = preds_ref[...].astype(jnp.float32)
        ln = lneg_ref[...].astype(jnp.float32)
        lp = lpos_ref[...].astype(jnp.float32)

        # softplus(x) = max(x, 0) + log(1 + exp(-|x|))  -> 1 exp + 1 log on the EUP.
        # (Any precision loss of log(1+t) for tiny t lands in the clamped regime anyway.)
        sp = jnp.maximum(x, 0.0) + jnp.log(1.0 + jnp.exp(-jnp.abs(x)))
        # log(clamp(p, lo, hi)) == clamp(log p, log lo, log hi): log is monotone, so this
        # reproduces torch.clamp(logits_, 1e-4, 1-1e-4) exactly.
        log_pos = jnp.clip(x - sp, _LOG_LO, _LOG_HI)   # log(clamp(sigmoid(x)))
        log_neg = jnp.clip(-sp, _LOG_LO, _LOG_HI)      # log(clamp(1 - sigmoid(x)))

        stats_ref[0:1, :] += jnp.sum(-ln * log_neg, axis=0, keepdims=True)
        stats_ref[1:2, :] += jnp.sum(-lp * log_pos, axis=0, keepdims=True)
        stats_ref[2:3, :] += jnp.sum(ln, axis=0, keepdims=True)
        stats_ref[3:4, :] += jnp.sum(lp, axis=0, keepdims=True)

        if ent_loss:
            pos = jnp.exp(log_pos)   # == clamp(sigmoid(x), lo, hi)
            neg = jnp.exp(log_neg)   # == clamp(1 - sigmoid(x), lo, hi)
            ent = neg * log_neg + pos * log_pos
            # Mask zero-padded tail elements (padding has preds=0 -> would add log(0.5)).
            base = (pl.program_id(0) * steps + pl.program_id(1)) * tile_r
            rows = jax.lax.broadcasted_iota(jnp.int32, (tile_r, lanes), 0)
            cols = jax.lax.broadcasted_iota(jnp.int32, (tile_r, lanes), 1)
            flat = (base + rows) * lanes + cols
            ent = jnp.where(flat < total_valid, ent, 0.0)
            stats_ref[4:5, :] += jnp.sum(ent, axis=0, keepdims=True)

    return kernel


def bce_loss(preds, label, weight=None, ent_loss: bool = False, tile_rows=None):
    """Pallas-TPU equivalent of BCELoss.forward(preds, label). Returns a scalar f32.

    preds: (N, C); label: (N, 2C) with label[:, :C] pairing with 1-sigmoid(preds) and
    label[:, C:] with sigmoid(preds) (i.e. torch.cat([1-p, p], dim=1) layout).
    `weight` is accepted for API parity and ignored (as in the PyTorch module).
    """
    del weight
    n, c = preds.shape
    assert label.shape == (n, 2 * c), (preds.shape, label.shape)
    total = n * c

    # Lane-dense fold: view (N, C) as (R, 128) when C divides 128 (free row-major reshape).
    lanes = 128 if (128 % c == 0) else c
    # TODO(synk): when C does not divide 128 a wrapper-side transpose to (C, N) would
    # restore lane density; the row-tiled fallback below is correct but lane-sparse.

    r = _cdiv(total, lanes)
    cap = tile_rows if tile_rows is not None else (512 if lanes >= 128 else 2048)
    tile_r = max(8, min(_round_up(r, 8), _round_up(cap, 8)))
    steps_total = _cdiv(r, tile_r)
    num_chunks = 2 if steps_total >= 4 else 1          # leading "parallel" axis (v7x: 2 TCs)
    steps = _cdiv(steps_total, num_chunks)
    r_pad = num_chunks * steps * tile_r
    pad = r_pad * lanes - total

    def _prep(a):
        a = a.reshape(-1)
        if pad:
            a = jnp.pad(a, (0, pad))                   # zero label padding -> no loss contrib
        return a.reshape(r_pad, lanes)

    preds_t = _prep(preds)
    lneg_t = _prep(label[:, :c])                       # pairs with 1 - sigmoid(preds)
    lpos_t = _prep(label[:, c:])                       # pairs with sigmoid(preds)

    kernel = _make_bce_kernel(lanes, tile_r, steps, total, ent_loss)
    in_spec = pl.BlockSpec((tile_r, lanes), lambda ch, s: (ch * steps + s, 0))

    stats = pl.pallas_call(
        kernel,
        out_shape=jax.ShapeDtypeStruct((num_chunks * 8, lanes), jnp.float32),
        grid=(num_chunks, steps),
        in_specs=[in_spec, in_spec, in_spec],
        out_specs=pl.BlockSpec((8, lanes), lambda ch, s: (ch, 0)),
        compiler_params=pltpu.CompilerParams(
            dimension_semantics=("parallel", "arbitrary"),
            vmem_limit_bytes=32 * 1024 * 1024,
        ),
    )(preds_t, lneg_t, lpos_t)

    # O(C) epilogue: combine per-chunk / per-lane partials, reweight, reduce to a scalar.
    stats = stats.reshape(num_chunks, 8, lanes).sum(axis=0)            # (8, lanes)
    per_c = stats[:4].reshape(4, lanes // c, c).sum(axis=1)            # (4, C)
    le_neg, le_pos, s_neg, s_pos = per_c[0], per_c[1], per_c[2], per_c[3]
    # As in PyTorch: 1/label.sum(dim=0) -> inf/nan if a label column sums to zero.
    loss = jnp.sum(le_neg / s_neg) + jnp.sum(le_pos / s_pos)
    if ent_loss:
        loss_ent = -jnp.sum(stats[4]) / n              # mean over batch of per-sample sums
        loss = loss + 0.1 * loss_ent
    return loss


def _bce_loss_reference(preds, label, ent_loss: bool = False):
    """Pure-JAX reference mirroring the PyTorch code, for a correctness check."""
    p = jax.nn.sigmoid(preds.astype(jnp.float32))
    logits_ = jnp.concatenate([1.0 - p, p], axis=1)
    logits_ = jnp.clip(logits_, CLAMP_LO, CLAMP_HI)
    label = label.astype(jnp.float32)
    loss_entries = jnp.sum(-label * jnp.log(logits_), axis=0)
    label_num_reverse = 1.0 / jnp.sum(label, axis=0)
    loss = jnp.sum(loss_entries * label_num_reverse)
    if ent_loss:
        loss_ent = -jnp.mean(jnp.sum(logits_ * jnp.log(logits_), axis=1))
        loss = loss + 0.1 * loss_ent
    return loss


if __name__ == "__main__":
    key = jax.random.PRNGKey(0)
    k1, k2, k3, k4 = jax.random.split(key, 4)

    def make_inputs(kp, ky, n, c):
        preds = jax.random.normal(kp, (n, c), dtype=jnp.float32)
        y = (jax.random.uniform(ky, (n, c)) > 0.5).astype(jnp.float32)
        # Guarantee every column of label has a nonzero sum (avoid 1/0, as PyTorch assumes).
        y = y.at[0].set(0.0).at[1].set(1.0)
        label = jnp.concatenate([1.0 - y, y], axis=1)   # (n, 2c)
        return preds, label

    # 1) Lane-dense folded path, single grid step, ent_loss=False (module default).
    preds, label = make_inputs(k1, k2, 512, 8)
    out = bce_loss(preds, label, ent_loss=False)
    jax.block_until_ready(out)
    ref = _bce_loss_reference(preds, label, ent_loss=False)
    assert jnp.allclose(out, ref, rtol=1e-5, atol=1e-5), (out, ref)

    # 2) Multi-step, dual-chunk grid with tail padding + entropy mask, ent_loss=True.
    preds2, label2 = make_inputs(k3, k4, 500, 8)
    out2 = bce_loss(preds2, label2, ent_loss=True, tile_rows=8)
    jax.block_until_ready(out2)
    ref2 = _bce_loss_reference(preds2, label2, ent_loss=True)
    assert jnp.allclose(out2, ref2, rtol=1e-5, atol=1e-5), (out2, ref2)

    # 3) Fallback path: C does not divide 128.
    k5, k6 = jax.random.split(k1)
    preds3, label3 = make_inputs(k5, k6, 64, 5)
    out3 = bce_loss(preds3, label3, ent_loss=True)
    jax.block_until_ready(out3)
    ref3 = _bce_loss_reference(preds3, label3, ent_loss=True)
    assert jnp.allclose(out3, ref3, rtol=1e-5, atol=1e-5), (out3, ref3)

    print("KERNEL_OK")
</pallas_src>

<mosaic_0001>
module attributes {stable_mosaic.version = 11 : i64} {
  func.func @kernel(%arg0: i32, %arg1: i32, %arg2: memref<32x128xf32, #tpu.memory_space<vmem>>, %arg3: memref<32x128xf32, #tpu.memory_space<vmem>>, %arg4: memref<32x128xf32, #tpu.memory_space<vmem>>, %arg5: memref<8x128xf32, #tpu.memory_space<vmem>>) attributes {dimension_semantics = [#tpu.dimension_semantics<parallel>, #tpu.dimension_semantics<arbitrary>], iteration_bounds = array<i64: 1, 1>, scalar_prefetch = 0 : i64, scratch_operands = 0 : i64, tpu.core_type = #tpu.core_type<tc>, window_params = [{transform_indices = @transform_0, window_bounds = array<i64: 32, 128>}, {transform_indices = @transform_1, window_bounds = array<i64: 32, 128>}, {transform_indices = @transform_2, window_bounds = array<i64: 32, 128>}, {transform_indices = @transform_3, window_bounds = array<i64: 8, 128>}]} {
    %c0_i32 = arith.constant 0 : i32
    %0 = arith.cmpi eq, %arg1, %c0_i32 : i32
    %1 = arith.extui %0 : i1 to i32
    %c0_i32_0 = arith.constant 0 : i32
    %2 = arith.cmpi ne, %1, %c0_i32_0 : i32
    scf.if %2 {
      %cst_32 = arith.constant 0.000000e+00 : f32
      %53 = vector.broadcast %cst_32 : f32 to vector<8x128xf32>
      %c0_33 = arith.constant 0 : index
      %c0_34 = arith.constant 0 : index
      %54 = vector.load %arg5[%c0_33, %c0_34] : memref<8x128xf32, #tpu.memory_space<vmem>>, vector<8x128xf32>
      tpu.vector_store %arg5[%c0_33, %c0_34], %53 {strides = array<i32>} : memref<8x128xf32, #tpu.memory_space<vmem>>, vector<8x128xf32>,
    } else {
    }
    %c0 = arith.constant 0 : index
    %c0_1 = arith.constant 0 : index
    %3 = vector.load %arg2[%c0, %c0_1] : memref<32x128xf32, #tpu.memory_space<vmem>>, vector<32x128xf32>
    %c0_2 = arith.constant 0 : index
    %c0_3 = arith.constant 0 : index
    %4 = vector.load %arg3[%c0_2, %c0_3] : memref<32x128xf32, #tpu.memory_space<vmem>>, vector<32x128xf32>
    %c0_4 = arith.constant 0 : index
    %c0_5 = arith.constant 0 : index
    %5 = vector.load %arg4[%c0_4, %c0_5] : memref<32x128xf32, #tpu.memory_space<vmem>>, vector<32x128xf32>
    %cst = arith.constant 0.000000e+00 : f32
    %6 = vector.broadcast %cst : f32 to vector<32x128xf32>
    %7 = arith.maximumf %3, %6 : vector<32x128xf32>
    %8 = math.absf %3 : vector<32x128xf32>
    %cst_6 = arith.constant 0.000000e+00 : f32
    %9 = vector.broadcast %cst_6 : f32 to vector<32x128xf32>
    %10 = arith.subf %9, %8 : vector<32x128xf32>
    %11 = math.exp %10 : vector<32x128xf32>
    %cst_7 = arith.constant 1.000000e+00 : f32
    %12 = vector.broadcast %cst_7 : f32 to vector<32x128xf32>
    %13 = arith.addf %12, %11 : vector<32x128xf32>
    %14 = math.log %13 : vector<32x128xf32>
    %15 = arith.addf %7, %14 : vector<32x128xf32>
    %16 = arith.subf %3, %15 : vector<32x128xf32>
    %cst_8 = arith.constant -9.21034049 : f32
    %cst_9 = arith.constant -1.000050e-04 : f32
    %17 = vector.broadcast %cst_8 : f32 to vector<32x128xf32>
    %18 = arith.maximumf %17, %16 : vector<32x128xf32>
    %19 = vector.broadcast %cst_9 : f32 to vector<32x128xf32>
    %20 = arith.minimumf %19, %18 : vector<32x128xf32>
    %cst_10 = arith.constant 0.000000e+00 : f32
    %21 = vector.broadcast %cst_10 : f32 to vector<32x128xf32>
    %22 = arith.subf %21, %15 : vector<32x128xf32>
    %cst_11 = arith.constant -9.21034049 : f32
    %cst_12 = arith.constant -1.000050e-04 : f32
    %23 = vector.broadcast %cst_11 : f32 to vector<32x128xf32>
    %24 = arith.maximumf %23, %22 : vector<32x128xf32>
    %25 = vector.broadcast %cst_12 : f32 to vector<32x128xf32>
    %26 = arith.minimumf %25, %24 : vector<32x128xf32>
    %c0_13 = arith.constant 0 : index
    %c0_14 = arith.constant 0 : index
    %27 = vector.load %arg5[%c0_13, %c0_14] : memref<8x128xf32, #tpu.memory_space<vmem>>, vector<1x128xf32>
    %cst_15 = arith.constant 0.000000e+00 : f32
    %28 = vector.broadcast %cst_15 : f32 to vector<32x128xf32>
    %29 = arith.subf %28, %4 : vector<32x128xf32>
    %30 = arith.mulf %29, %26 : vector<32x128xf32>
    %cst_16 = arith.constant dense<0.000000e+00> : vector<128xf32>
    %31 = vector.multi_reduction <add>, %30, %cst_16 [0] : vector<32x128xf32> to vector<128xf32>
    %32 = vector.shape_cast %31 : vector<128xf32> to vector<1x128xf32>
    %33 = arith.addf %27, %32 : vector<1x128xf32>
    %c0_17 = arith.constant 0 : index
    %c0_18 = arith.constant 0 : index
    %34 = vector.load %arg5[%c0_17, %c0_18] : memref<8x128xf32, #tpu.memory_space<vmem>>, vector<1x128xf32>
    tpu.vector_store %arg5[%c0_17, %c0_18], %33 {strides = array<i32>} : memref<8x128xf32, #tpu.memory_space<vmem>>, vector<1x128xf32>,
    %c1 = arith.constant 1 : index
    %c0_19 = arith.constant 0 : index
    %35 = vector.load %arg5[%c1, %c0_19] : memref<8x128xf32, #tpu.memory_space<vmem>>, vector<1x128xf32>
    %cst_20 = arith.constant 0.000000e+00 : f32
    %36 = vector.broadcast %cst_20 : f32 to vector<32x128xf32>
    %37 = arith.subf %36, %5 : vector<32x128xf32>
    %38 = arith.mulf %37, %20 : vector<32x128xf32>
    %cst_21 = arith.constant dense<0.000000e+00> : vector<128xf32>
    %39 = vector.multi_reduction <add>, %38, %cst_21 [0] : vector<32x128xf32> to vector<128xf32>
    %40 = vector.shape_cast %39 : vector<128xf32> to vector<1x128xf32>
    %41 = arith.addf %35, %40 : vector<1x128xf32>
    %c1_22 = arith.constant 1 : index
    %c0_23 = arith.constant 0 : index
    %42 = vector.load %arg5[%c1_22, %c0_23] : memref<8x128xf32, #tpu.memory_space<vmem>>, vector<1x128xf32>
    tpu.vector_store %arg5[%c1_22, %c0_23], %41 {strides = array<i32>} : memref<8x128xf32, #tpu.memory_space<vmem>>, vector<1x128xf32>,
    %c2 = arith.constant 2 : index
    %c0_24 = arith.constant 0 : index
    %43 = vector.load %arg5[%c2, %c0_24] : memref<8x128xf32, #tpu.memory_space<vmem>>, vector<1x128xf32>
    %cst_25 = arith.constant dense<0.000000e+00> : vector<128xf32>
    %44 = vector.multi_reduction <add>, %4, %cst_25 [0] : vector<32x128xf32> to vector<128xf32>
    %45 = vector.shape_cast %44 : vector<128xf32> to vector<1x128xf32>
    %46 = arith.addf %43, %45 : vector<1x128xf32>
    %c2_26 = arith.constant 2 : index
    %c0_27 = arith.constant 0 : index
    %47 = vector.load %arg5[%c2_26, %c0_27] : memref<8x128xf32, #tpu.memory_space<vmem>>, vector<1x128xf32>
    tpu.vector_store %arg5[%c2_26, %c0_27], %46 {strides = array<i32>} : memref<8x128xf32, #tpu.memory_space<vmem>>, vector<1x128xf32>,
    %c3 = arith.constant 3 : index
    %c0_28 = arith.constant 0 : index
    %48 = vector.load %arg5[%c3, %c0_28] : memref<8x128xf32, #tpu.memory_space<vmem>>, vector<1x128xf32>
    %cst_29 = arith.constant dense<0.000000e+00> : vector<128xf32>
    %49 = vector.multi_reduction <add>, %5, %cst_29 [0] : vector<32x128xf32> to vector<128xf32>
    %50 = vector.shape_cast %49 : vector<128xf32> to vector<1x128xf32>
    %51 = arith.addf %48, %50 : vector<1x128xf32>
    %c3_30 = arith.constant 3 : index
    %c0_31 = arith.constant 0 : index
    %52 = vector.load %arg5[%c3_30, %c0_31] : memref<8x128xf32, #tpu.memory_space<vmem>>, vector<1x128xf32>
    tpu.vector_store %arg5[%c3_30, %c0_31], %51 {strides = array<i32>} : memref<8x128xf32, #tpu.memory_space<vmem>>, vector<1x128xf32>,
    return
  }
  func.func @transform_0(%arg0: i32, %arg1: i32) -> (i32, i32) {
    %c1_i32 = arith.constant 1 : i32
    %0 = arith.muli %arg0, %c1_i32 : i32
    %1 = arith.addi %0, %arg1 : i32
    %c0_i32 = arith.constant 0 : i32
    %c0_i32_0 = arith.constant 0 : i32
    return %1, %c0_i32 : i32, i32
  }
  func.func @transform_1(%arg0: i32, %arg1: i32) -> (i32, i32) {
    %c1_i32 = arith.constant 1 : i32
    %0 = arith.muli %arg0, %c1_i32 : i32
    %1 = arith.addi %0, %arg1 : i32
    %c0_i32 = arith.constant 0 : i32
    %c0_i32_0 = arith.constant 0 : i32
    return %1, %c0_i32 : i32, i32
  }
  func.func @transform_2(%arg0: i32, %arg1: i32) -> (i32, i32) {
    %c1_i32 = arith.constant 1 : i32
    %0 = arith.muli %arg0, %c1_i32 : i32
    %1 = arith.addi %0, %arg1 : i32
    %c0_i32 = arith.constant 0 : i32
    %c0_i32_0 = arith.constant 0 : i32
    return %1, %c0_i32 : i32, i32
  }
  func.func @transform_3(%arg0: i32, %arg1: i32) -> (i32, i32) {
    %c0_i32 = arith.constant 0 : i32
    %c0_i32_0 = arith.constant 0 : i32
    return %arg0, %c0_i32 : i32, i32
  }
}

</mosaic_0001>

<bundles_post_ra>
// kernel: tpu_custom_call.1
= control target key start
LH: loop header
LB: loop body
LE: loop exit
PB: predicated region body
PF: predicated region fallthrough
CT: control target
= control target key end

     0   :  { %8 = vsyncpa [#allocation3], 0  ;;  %s491_s0 = inlined_call_operand.hbm [shape: f32[32,128], index: 0, kind: input, shape index: {}]   ;;  %s492_s1 = inlined_call_operand.hbm [shape: f32[32,128], index: 1, kind: input, shape index: {}]   ;;  %s493_s2 = inlined_call_operand.hbm [shape: f32[32,128], index: 2, kind: input, shape index: {}]   ;;  %s494_s3 = inlined_call_operand.hbm [shape: f32[8,128], index: 3, kind: output, shape index: {}]  }
   0x1   :  { %9 = vsyncpa [#allocation6], 0 }
   0x2   :  { %10 = vsyncpa [#allocation4], 0  ;;  %s348_s12 = smov [#allocation5]   ;;  %s349_s14 = smov [#allocation2]  }
   0x3   :  { %s36_s13 = sshll.u32 %s348_s12, 4  ;;  %s20_s15 = sshll.u32 %s349_s14, 4  ;;  %s37_s13 = int_to_ptr.vmem [resolvable:$true] %s36_s13  ;;  %s375_s15 = int_to_ptr.vmem [resolvable:$true] %s20_s15 }
   0x4   :  { %s254_s18 = scalar_lea.hbm %s492_s1, 512 }
   0x5   :  { %p255_p0 = scmp.ne.s32.totalorder %s492_s1, %s254_s18  ;;  %p258_p1 = scmp.lt.u32.totalorder %s254_s18, %s492_s1 }
   0x7   :  { %p260_p2 = pnand %p258_p1, %p255_p0 }
   0x9   :  { %263 = shalt.err (!%p260_p2)
}
   0xa   :  { %s264_s23 = scalar_lea.vmem %s37_s13, 512  ;;  %p269_p4 = scmp.lt.s32.totalorder %s37_s13, %s37_s13 }
   0xb   :  { %p265_p3 = scmp.ne.s32.totalorder %s37_s13, %s264_s23  ;;  %p270_p5 = scmp.lt.s32.totalorder %s264_s23, %s264_s23 }
   0xd   :  { %p271_p6 = por %p270_p5, %p269_p4 }
   0xf   :  { %p272_p7 = pnand %p271_p6, %p265_p3 }
  0x11   :  { %275 = shalt.err (!%p272_p7)
}
  0x12   :  { %s350_s24 = smov 128   ;;  %s351_s25 = smov 8  }
  0x13   :  { %42 = dma.hbm_to_vmem [thread:$0]  %s492_s1, 512, %s37_s13, [#allocation6], %s350_s24, %s350_s24, %s351_s25  }
  0x14   :  { %s276_s30 = scalar_lea.hbm %s491_s0, 512 }
  0x15   :  { %p277_p8 = scmp.ne.s32.totalorder %s491_s0, %s276_s30  ;;  %p280_p9 = scmp.lt.u32.totalorder %s276_s30, %s491_s0 }
  0x17   :  { %p282_p10 = pnand %p280_p9, %p277_p8 }
  0x19   :  { %285 = shalt.err (!%p282_p10)
}
  0x1a   :  { %s286_s8 = scalar_lea.vmem %s375_s15, 512  ;;  %p291_p12 = scmp.lt.s32.totalorder %s375_s15, %s375_s15 }
  0x1b   :  { %p287_p11 = scmp.ne.s32.totalorder %s375_s15, %s286_s8  ;;  %p292_p13 = scmp.lt.s32.totalorder %s286_s8, %s286_s8 }
  0x1d   :  { %p293_p0 = por %p292_p13, %p291_p12 }
  0x1f   :  { %p294_p1 = pnand %p293_p0, %p287_p11 }
  0x21   :  { %297 = shalt.err (!%p294_p1)
}
  0x22   :  { %26 = dma.hbm_to_vmem [thread:$0]  %s491_s0, 512, %s375_s15, [#allocation3], %s350_s24, %s350_s24, %s351_s25  }
  0x23   :  { %s352_s10 = smov [#allocation7]   ;;  %s298_s14 = scalar_lea.hbm %s493_s2, 512 }
  0x24   :  { %s52_s11 = sshll.u32 %s352_s10, 4  ;;  %p299_p2 = scmp.ne.s32.totalorder %s493_s2, %s298_s14  ;;  %s53_s11 = int_to_ptr.vmem [resolvable:$true] %s52_s11 }
  0x25   :  { %p302_p3 = scmp.lt.u32.totalorder %s298_s14, %s493_s2 }
  0x27   :  { %p304_p4 = pnand %p302_p3, %p299_p2 }
  0x29   :  { %307 = shalt.err (!%p304_p4)
}
  0x2a   :  { %s308_s20 = scalar_lea.vmem %s53_s11, 512  ;;  %p313_p6 = scmp.lt.s32.totalorder %s53_s11, %s53_s11 }
  0x2b   :  { %p309_p5 = scmp.ne.s32.totalorder %s53_s11, %s308_s20  ;;  %p314_p7 = scmp.lt.s32.totalorder %s308_s20, %s308_s20 }
  0x2d   :  { %p315_p8 = por %p314_p7, %p313_p6 }
  0x2f   :  { %p316_p9 = pnand %p315_p8, %p309_p5 }
  0x31   :  { %319 = shalt.err (!%p316_p9)
}
  0x32   :  { %58 = dma.hbm_to_vmem [thread:$0]  %s493_s2, 512, %s53_s11, [#allocation6], %s350_s24, %s350_s24, %s351_s25  }
  0x33   :  { %342 = dma.done.wait [#allocation3], 512  }
  0x34   :  { %343 = vsyncadd [#allocation3], 4294966784 }
  0x35   :  { %344 = dma.done.wait [#allocation6], 1024  }
  0x36   :  { %345 = vsyncadd [#allocation6], 4294966272  ;;  %v353_v0 = vmov 0.0   ;;  %v427_v1 = vld [vmem:[#allocation2] sm:$0xff]  ;;  %v429_v2 = vld [vmem:[#allocation2 + $0x8] sm:$0xff]  ;;  %s354_s2 = smov [#allocation8]  }
  0x37   :  { %78 = vst [vmem:[#allocation8] sm:$0xff] %v353_v0  ;;  %v431_v3 = vld [vmem:[#allocation2 + $0x10] sm:$0xff]  ;;  %v433_v4 = vld [vmem:[#allocation2 + $0x18] sm:$0xff]  ;;  %v435_v5 = vld [vmem:[#allocation5] sm:$0xff]  ;;  %v95_v7 = vand.u32 2147483647, %v427_v1 }
  0x38   :  { %v437_v6 = vld [vmem:[#allocation5 + $0x8] sm:$0xff]  ;;  %v96_v9 = vand.u32 2147483647, %v429_v2  ;;  %v97_v10 = vand.u32 2147483647, %v431_v3  ;;  %v445_v12 = vld [vmem:[#allocation5 + $0x10] sm:$0xff] }
  0x39   :  { %v192_v8 = vadd.f32 %v437_v6, %v435_v5  ;;  %v98_v11 = vand.u32 2147483647, %v433_v4  ;;  %v99_v13 = vsub.f32 0.0, %v95_v7  ;;  %v447_v17 = vld [vmem:[#allocation7] sm:$0xff]  ;;  %v449_v18 = vld [vmem:[#allocation7 + $0x8] sm:$0xff]  ;;  %v452_v20 = vld [vmem:[#allocation5 + $0x18] sm:$0xff] }
  0x3a   :  { %v100_v14 = vsub.f32 0.0, %v96_v9  ;;  %v101_v15 = vsub.f32 0.0, %v97_v10  ;;  %v204_v22 = vadd.f32 %v449_v18, %v447_v17  ;;  %v457_v27 = vld [vmem:[#allocation7 + $0x10] sm:$0xff]  ;;  %v460_v30 = vld [vmem:[#allocation7 + $0x18] sm:$0xff]  ;;  %v91_v55 = vmax.f32 %v427_v1, 0.0  ;;  %s221_s21 = sshll.u32 %s354_s2, 4  ;;  %s222_s21 = int_to_ptr.vmem [resolvable:$true] %s221_s21 }
  0x3b   :  { %v102_v16 = vsub.f32 0.0, %v98_v11  ;;  %v193_v19 = vadd.f32 %v192_v8, %v445_v12  ;;  %v103_v21 = vmul.f32 1.442695, %v99_v13  ;;  %v92_v57 = vmax.f32 %v429_v2, 0.0  ;;  %s320_s22 = scalar_lea.vmem %s222_s21, 128  ;;  %p325_p11 = scmp.lt.s32.totalorder %s222_s21, %s222_s21 }
  0x3c   :  { %v105_v23 = vmul.f32 1.442695, %v100_v14  ;;  %v107_v24 = vmul.f32 1.442695, %v101_v15  ;;  %v205_v29 = vadd.f32 %v204_v22, %v457_v27  ;;  %v93_v59 = vmax.f32 %v431_v3, 0.0  ;;  %p321_p10 = scmp.ne.s32.totalorder %s222_s21, %s320_s22  ;;  %p326_p12 = scmp.lt.s32.totalorder %s320_s22, %s320_s22 }
  0x3d   :  { %v109_v25 = vmul.f32 1.442695, %v102_v16  ;;  %v194_v26 = vadd.f32 %v193_v19, %v452_v20  ;;  %238 = vpow2.f32 %v103_v21  ;;  %v94_v62 = vmax.f32 %v433_v4, 0.0 }
  0x3e   :  { %240 = vpow2.f32 %v105_v23  ;;  %v206_v32 = vadd.f32 %v205_v29, %v460_v30  ;;  %v191_v40 = vld [vmem:[#allocation8 + $0x2] sm:$0x1]  ;;  %v203_v52 = vld [vmem:[#allocation8 + $0x3] sm:$0x1]  ;;  %v152_v0 = vsub.f32 0.0, %v435_v5  ;;  %v153_v7 = vsub.f32 0.0, %v437_v6  ;;  %p327_p13 = por %p326_p12, %p325_p11 }
  0x3f   :  { %v195_v28 = vrot.slane %v194_v26, 4  ;;  %242 = vpow2.f32 %v107_v24  ;;  %v154_v11 = vsub.f32 0.0, %v445_v12  ;;  %v155_v13 = vsub.f32 0.0, %v452_v20 }
  0x40   :  { %244 = vpow2.f32 %v109_v25  ;;  %v207_v34 = vrot.slane %v206_v32, 4  ;;  %v172_v16 = vsub.f32 0.0, %v447_v17  ;;  %v173_v19 = vsub.f32 0.0, %v449_v18  ;;  %p328_p0 = pnand %p327_p13, %p321_p10 }
  0x41   :  { %v196_v31 = vadd.f32 %v195_v28, %v194_v26  ;;  %v174_v5 = vsub.f32 0.0, %v457_v27  ;;  %v175_v12 = vsub.f32 0.0, %v460_v30 }
  0x42   :  { %v208_v36 = vadd.f32 %v207_v34, %v206_v32 }
  0x43   :  { %v197_v33 = vrot.slane %v196_v31, 2 }
  0x44   :  { %v209_v38 = vrot.slane %v208_v36, 2 }
  0x45   :  { %v198_v35 = vadd.f32 %v197_v33, %v196_v31 }
  0x46   :  { %v210_v44 = vadd.f32 %v209_v38, %v208_v36 }
  0x47   :  { %v199_v37 = vrot.slane %v198_v35, 1  ;;  %v239_v39 = vpop.eup %238 }
  0x48   :  { %v241_v41 = vpop.eup %240  ;;  %v111_v42 = vadd.f32 1.0, %v239_v39  ;;  %v211_v50 = vrot.slane %v210_v44, 1 }
  0x49   :  { %v200_v43 = vadd.f32 %v199_v37, %v198_v35  ;;  %v243_v45 = vpop.eup %242  ;;  %v112_v46 = vadd.f32 1.0, %v241_v41 }
  0x4a   :  { %v245_v47 = vpop.eup %244  ;;  %v113_v48 = vadd.f32 1.0, %v243_v45  ;;  %246 = vlog2.f32 %v111_v42  ;;  %v212_v53 = vadd.f32 %v211_v50, %v210_v44 }
  0x4b   :  { %v201_v49 = vadd.f32 %v200_v43, %v191_v40  ;;  %v114_v51 = vadd.f32 1.0, %v245_v47  ;;  %248 = vlog2.f32 %v112_v46 }
  0x4c   :  { %250 = vlog2.f32 %v113_v48  ;;  %v213_v54 = vadd.f32 %v212_v53, %v203_v52 }
  0x4d   :  { %202 = vst [vmem:[#allocation8 + $0x2] sm:$0x1] %v201_v49  ;;  %252 = vlog2.f32 %v114_v51 }
  0x4e   :  { %214 = vst [vmem:[#allocation8 + $0x3] sm:$0x1] %v213_v54 }
  0x54   :  { %v247_v56 = vpop.eup %246 }
  0x55   :  { %v249_v58 = vpop.eup %248  ;;  %v116_v60 = vmul.f32 0.6931472, %v247_v56 }
  0x56   :  { %v251_v61 = vpop.eup %250  ;;  %v118_v63 = vmul.f32 0.6931472, %v249_v58 }
  0x57   :  { %v253_v8 = vpop.eup %252  ;;  %v120_v9 = vmul.f32 0.6931472, %v251_v61  ;;  %v123_v10 = vadd.f32 %v116_v60, %v91_v55 }
  0x58   :  { %v122_v14 = vmul.f32 0.6931472, %v253_v8  ;;  %v124_v15 = vadd.f32 %v118_v63, %v92_v57 }
  0x59   :  { %v125_v21 = vadd.f32 %v120_v9, %v93_v59  ;;  %v139_v22 = vsub.f32 0.0, %v123_v10  ;;  %v127_v23 = vsub.f32 %v427_v1, %v123_v10 }
  0x5a   :  { %v126_v6 = vadd.f32 %v122_v14, %v94_v62  ;;  %v140_v24 = vsub.f32 0.0, %v124_v15  ;;  %v128_v25 = vsub.f32 %v429_v2, %v124_v15  ;;  %v151_v62 = vld [vmem:[#allocation8] sm:$0x1] }
  0x5b   :  { %v141_v26 = vsub.f32 0.0, %v125_v21  ;;  %v143_v20 = vmax.f32 %v139_v22, -9.2103405  ;;  %v129_v28 = vsub.f32 %v431_v3, %v125_v21  ;;  %v131_v29 = vmax.f32 %v127_v23, -9.2103405 }
  0x5c   :  { %v142_v17 = vsub.f32 0.0, %v126_v6  ;;  %v144_v31 = vmax.f32 %v140_v24, -9.2103405  ;;  %v130_v18 = vsub.f32 %v433_v4, %v126_v6  ;;  %v132_v32 = vmax.f32 %v128_v25, -9.2103405 }
  0x5d   :  { %v145_v33 = vmax.f32 %v141_v26, -9.2103405  ;;  %v147_v1 = vmin.f32 %v143_v20, -0.000100005  ;;  %v133_v34 = vmax.f32 %v129_v28, -9.2103405 }
  0x5e   :  { %v146_v27 = vmax.f32 %v142_v17, -9.2103405  ;;  %v148_v35 = vmin.f32 %v144_v31, -0.000100005  ;;  %v134_v36 = vmax.f32 %v130_v18, -9.2103405 }
  0x5f   :  { %v149_v37 = vmin.f32 %v145_v33, -0.000100005  ;;  %v156_v2 = vmul.f32 %v152_v0, %v147_v1  ;;  %v135_v38 = vmin.f32 %v131_v29, -0.000100005  ;;  %v136_v30 = vmin.f32 %v132_v32, -0.000100005 }
  0x60   :  { %v150_v39 = vmin.f32 %v146_v27, -0.000100005  ;;  %v157_v40 = vmul.f32 %v153_v7, %v148_v35  ;;  %v137_v41 = vmin.f32 %v133_v34, -0.000100005  ;;  %v138_v3 = vmin.f32 %v134_v36, -0.000100005 }
  0x61   :  { %v158_v42 = vmul.f32 %v154_v11, %v149_v37  ;;  %v176_v43 = vmul.f32 %v172_v16, %v135_v38  ;;  %v177_v44 = vmul.f32 %v173_v19, %v136_v30  ;;  %v171_v7 = vld [vmem:[#allocation8 + $0x1] sm:$0x1] }
  0x62   :  { %v159_v45 = vmul.f32 %v155_v13, %v150_v39  ;;  %v160_v4 = vadd.f32 %v157_v40, %v156_v2  ;;  %v178_v46 = vmul.f32 %v174_v5, %v137_v41  ;;  %v179_v47 = vmul.f32 %v175_v12, %v138_v3 }
  0x63   :  { %v180_v48 = vadd.f32 %v177_v44, %v176_v43 }
  0x64   :  { %v161_v49 = vadd.f32 %v160_v4, %v158_v42 }
  0x65   :  { %v181_v50 = vadd.f32 %v180_v48, %v178_v46 }
  0x66   :  { %v162_v51 = vadd.f32 %v161_v49, %v159_v45 }
  0x67   :  { %v182_v52 = vadd.f32 %v181_v50, %v179_v47 }
  0x68   :  { %v163_v53 = vrot.slane %v162_v51, 4 }
  0x69   :  { %v183_v54 = vrot.slane %v182_v52, 4 }
  0x6a   :  { %v164_v55 = vadd.f32 %v163_v53, %v162_v51 }
  0x6b   :  { %v184_v56 = vadd.f32 %v183_v54, %v182_v52 }
  0x6c   :  { %v165_v57 = vrot.slane %v164_v55, 2 }
  0x6d   :  { %v185_v58 = vrot.slane %v184_v56, 2 }
  0x6e   :  { %v166_v59 = vadd.f32 %v165_v57, %v164_v55 }
  0x6f   :  { %v186_v60 = vadd.f32 %v185_v58, %v184_v56 }
  0x70   :  { %v167_v61 = vrot.slane %v166_v59, 1 }
  0x71   :  { %v187_v63 = vrot.slane %v186_v60, 1 }
  0x72   :  { %v168_v0 = vadd.f32 %v167_v61, %v166_v59 }
  0x73   :  { %v188_v8 = vadd.f32 %v187_v63, %v186_v60 }
  0x74   :  { %v169_v9 = vadd.f32 %v168_v0, %v151_v62 }
  0x75   :  { %v189_v10 = vadd.f32 %v188_v8, %v171_v7 }
  0x76   :  { %170 = vst [vmem:[#allocation8] sm:$0x1] %v169_v9 }
  0x77   :  { %190 = vst [vmem:[#allocation8 + $0x1] sm:$0x1] %v189_v10 }
  0x78   :  { %331 = shalt.err (!%p328_p0)
}
  0x79   :  { %s332_s25 = scalar_lea.hbm %s494_s3, 128 }
  0x7a   :  { %p333_p1 = scmp.ne.s32.totalorder %s494_s3, %s332_s25  ;;  %p336_p2 = scmp.lt.u32.totalorder %s332_s25, %s494_s3 }
  0x7c   :  { %p338_p3 = pnand %p336_p2, %p333_p1 }
  0x7e   :  { %341 = shalt.err (!%p338_p3)
}
  0x7f   :  { %224 = dma.vmem_to_hbm [thread:$0]  %s222_s21, 128, %s494_s3, [#allocation4]  }
  0x80   :  { %346 = dma.done.wait [#allocation4], 128  }
  0x81   :  { %347 = vsyncadd [#allocation4], 4294967168 }
  0x82   :  { %228 = vsyncpa [#allocation3], 1 }
  0x83   :  { %229 = vsyncpa [#allocation6], 1 }
  0x84   :  { %230 = vsyncpa [#allocation4], 1 }

</bundles_post_ra>
